<compile_context>
chip_gen: v7x
topology: tpu7x:2x2x1
jax: 0.10.0
libtpu: 0.0.40
codegen_flags: <defaults>
</compile_context>

<pallas_src>
import functools

import jax
import jax.numpy as jnp
from jax.experimental import pallas as pl
from jax.experimental.pallas import tpu as pltpu

_DEFAULT_THRESHOLD = 0.5     # float-image threshold (PIL uint8 default ~ 128/255)
_DEFAULT_BOUND = 1.0         # float-image max value
_TARGET_TILE_BYTES = 4 << 20 # ~4 MiB per pipeline buffer
_LANE_CANDIDATES = (1024, 512, 256, 128)


def _round_up(x, m):
    return (x + m - 1) // m * m


def _solarize_kernel(x_ref, o_ref, *, threshold, bound):
    """Elementwise solarization on one lane-dense (tile_rows, lanes) block."""
    x = x_ref[...]
    o_ref[...] = jnp.where(x >= threshold, bound - x, x)


def _pick_layout(shape):
    """Choose a zero-copy 2D (rows, lanes) view of a contiguous array."""
    total = 1
    for d in shape:
        total *= d
    for lanes in _LANE_CANDIDATES:
        if total % lanes == 0:
            return total // lanes, lanes
    # Rare fallback (element count not a multiple of 128): keep the natural
    # last dim as the lane dim.  Full-width blocks are legal for any W; stores
    # are masked/narrow but the relayout stays zero-copy.
    w = shape[-1]
    return total // w, w


def _pick_tile_rows(m, lanes, itemsize):
    """Dtype-aware tile height; multiple of the native sublane, grid >= 2 when possible."""
    sublane = {4: 8, 2: 16, 1: 32}.get(itemsize, 8)
    max_rows = max(sublane,
                   (_TARGET_TILE_BYTES // (lanes * itemsize)) // sublane * sublane)
    # Cap at ceil(m/2) so both v7x TensorCores get work for medium slabs.
    half = _round_up(pl.cdiv(m, 2), sublane)
    tile_rows = min(max_rows, half)
    if tile_rows >= m:
        return m          # one full-extent block (always a legal block shape)
    return tile_rows      # multiple of the sublane; boundary block is clipped


def _solarize_array(img, threshold, bound):
    shape = img.shape
    dtype = img.dtype
    itemsize = jnp.dtype(dtype).itemsize
    m, lanes = _pick_layout(shape)
    tile_rows = _pick_tile_rows(m, lanes, itemsize)
    num_blocks = pl.cdiv(m, tile_rows)
    total = m * lanes

    x2d = img.reshape(m, lanes)   # zero-copy relayout of contiguous data

    kernel = functools.partial(_solarize_kernel, threshold=threshold, bound=bound)
    out2d = pl.pallas_call(
        kernel,
        out_shape=jax.ShapeDtypeStruct((m, lanes), dtype),
        grid_spec=pltpu.PrefetchScalarGridSpec(
            num_scalar_prefetch=0,
            grid=(num_blocks,),
            in_specs=[pl.BlockSpec((tile_rows, lanes), lambda i: (i, 0))],
            out_specs=pl.BlockSpec((tile_rows, lanes), lambda i: (i, 0)),
        ),
        compiler_params=pltpu.CompilerParams(
            dimension_semantics=("parallel",),
            vmem_limit_bytes=32 << 20,
        ),
        cost_estimate=pl.CostEstimate(
            flops=3 * total,            # cmp + sub + select
            transcendentals=0,
            bytes_accessed=2 * total * itemsize,
        ),
    )(x2d)
    return out2d.reshape(shape)


@functools.partial(jax.jit, static_argnames=("p", "threshold", "bound"))
def solarization(img, key, *, p, threshold=_DEFAULT_THRESHOLD, bound=_DEFAULT_BOUND):
    """Pallas-backed Solarization transform.

    img       : float array (e.g. (N, C, H, W)), values in [0, bound]
    key       : jax PRNG key driving the Bernoulli(p) "apply it?" decision
    p         : probability of applying solarization (static)
    threshold : invert pixels >= threshold (static; 0.5 for [0,1] floats,
                use 128/255 to match PIL uint8 semantics exactly)
    bound     : maximum pixel value (static)
    """
    def _apply(v):
        return _solarize_array(v, threshold, bound)

    if p >= 1.0:          # static short-circuits: no cond, no RNG
        return _apply(img)
    if p <= 0.0:
        return img

    # One Bernoulli draw per call (matches the PyTorch module, which gates the
    # whole forward on a single `random.random() < self.p`).  All relayout is
    # inside the apply branch, so the skip path does zero HBM work.
    apply = jax.random.uniform(key, ()) < p
    return jax.lax.cond(apply, _apply, lambda v: v, img)


if __name__ == "__main__":
    key = jax.random.PRNGKey(0)
    k_img, k_img2, k_decide = jax.random.split(key, 3)

    # Small NCHW image batch, values in [0, 1].  2*4*16*16 = 2048 -> lane-dense
    # (2, 1024) slab with a zero-copy reshape.
    x = jax.random.uniform(k_img, (2, 4, 16, 16), dtype=jnp.float32)

    # p = 1.0 -> always solarize (deterministic check of the hot path).
    y = jax.block_until_ready(solarization(x, k_decide, p=1.0))
    expected = jnp.where(x >= _DEFAULT_THRESHOLD, _DEFAULT_BOUND - x, x)
    assert jnp.allclose(y, expected, atol=1e-6), "solarize mismatch (lane-dense path)"

    # p = 0.0 -> never solarize (identity / skip path, no kernel launch).
    y_id = jax.block_until_ready(solarization(x, k_decide, p=0.0))
    assert jnp.allclose(y_id, x), "identity mismatch"

    # Probabilistic path compiles & runs (single Bernoulli draw per call).
    y_p = jax.block_until_ready(solarization(x, k_decide, p=0.5))
    assert y_p.shape == x.shape and y_p.dtype == x.dtype

    # Ragged shape (element count not a multiple of 128) exercises the
    # zero-copy natural-width fallback with a clipped boundary block.
    x2 = jax.random.uniform(k_img2, (2, 3, 15, 20), dtype=jnp.float32)
    y2 = jax.block_until_ready(solarization(x2, k_decide, p=1.0))
    expected2 = jnp.where(x2 >= _DEFAULT_THRESHOLD, _DEFAULT_BOUND - x2, x2)
    assert jnp.allclose(y2, expected2, atol=1e-6), "solarize mismatch (fallback path)"

    print("KERNEL_OK")
</pallas_src>

<mosaic_0001>
module attributes {stable_mosaic.version = 11 : i64} {
  func.func @_solarize_kernel(%arg0: i32, %arg1: memref<2x1024xf32, #tpu.memory_space<vmem>>, %arg2: memref<2x1024xf32, #tpu.memory_space<vmem>>) attributes {dimension_semantics = [#tpu.dimension_semantics<parallel>], iteration_bounds = array<i64: 1>, scalar_prefetch = 0 : i64, scratch_operands = 0 : i64, tpu.core_type = #tpu.core_type<tc>, window_params = [{transform_indices = @transform_0, window_bounds = array<i64: 2, 1024>}, {transform_indices = @transform_1, window_bounds = array<i64: 2, 1024>}]} {
    %c0 = arith.constant 0 : index
    %c0_0 = arith.constant 0 : index
    %0 = vector.load %arg1[%c0, %c0_0] : memref<2x1024xf32, #tpu.memory_space<vmem>>, vector<2x1024xf32>
    %cst = arith.constant 5.000000e-01 : f32
    %1 = vector.broadcast %cst : f32 to vector<2x1024xf32>
    %2 = arith.cmpf oge, %0, %1 : vector<2x1024xf32>
    %cst_1 = arith.constant 1.000000e+00 : f32
    %3 = vector.broadcast %cst_1 : f32 to vector<2x1024xf32>
    %4 = arith.subf %3, %0 : vector<2x1024xf32>
    %5 = arith.select %2, %4, %0 : vector<2x1024xi1>, vector<2x1024xf32>
    %c0_2 = arith.constant 0 : index
    %c0_3 = arith.constant 0 : index
    %6 = vector.load %arg2[%c0_2, %c0_3] : memref<2x1024xf32, #tpu.memory_space<vmem>>, vector<2x1024xf32>
    tpu.vector_store %arg2[%c0_2, %c0_3], %5 {strides = array<i32>} : memref<2x1024xf32, #tpu.memory_space<vmem>>, vector<2x1024xf32>,
    return
  }
  func.func @transform_0(%arg0: i32) -> (i32, i32) {
    %c0_i32 = arith.constant 0 : i32
    %c0_i32_0 = arith.constant 0 : i32
    return %arg0, %c0_i32 : i32, i32
  }
  func.func @transform_1(%arg0: i32) -> (i32, i32) {
    %c0_i32 = arith.constant 0 : i32
    %c0_i32_0 = arith.constant 0 : i32
    return %arg0, %c0_i32 : i32, i32
  }
}

</mosaic_0001>

<bundles_post_ra>
// kernel: solarization.1
= control target key start
LH: loop header
LB: loop body
LE: loop exit
PB: predicated region body
PF: predicated region fallthrough
CT: control target
= control target key end

     0   :  { %s44_s0 = inlined_call_operand.vmem [shape: f32[2,1024], index: 0, kind: input, shape index: {}]   ;;  %s45_s1 = inlined_call_operand.vmem [shape: f32[2,1024], index: 1, kind: output, shape index: {}]  }
   0x1   :  { %v8_v0 = vld [vmem:[%s44_s0] sm:$0xff]  ;;  %v9_v1 = vld [vmem:[%s44_s0 + $0x8] sm:$0xff] }
   0x2   :  { %vm10_vm0 = vcmp.ge.f32.partialorder %v8_v0, 0.5  ;;  %v12_v2 = vsub.f32 1.0, %v8_v0  ;;  %vm11_vm1 = vcmp.ge.f32.partialorder %v9_v1, 0.5  ;;  %v13_v3 = vsub.f32 1.0, %v9_v1 }
   0x4   :  { %v14_v4 = vsel %vm10_vm0, %v12_v2, %v8_v0  ;;  %v15_v5 = vsel %vm11_vm1, %v13_v3, %v9_v1 }
   0x5   :  { %16 = vst [vmem:[%s45_s1] sm:$0xff] %v14_v4  ;;  %17 = vst [vmem:[%s45_s1 + $0x8] sm:$0xff] %v15_v5 }

</bundles_post_ra>
